<compile_context>
chip_gen: v7x
topology: tpu7x:2x2x1
jax: 0.10.0
libtpu: 0.0.40
codegen_flags: <defaults>
</compile_context>

<pallas_src>
import functools

import jax
import jax.numpy as jnp
from jax.experimental import pallas as pl
from jax.experimental.pallas import tpu as pltpu

LN_EPS = 1e-12


def _round_up(x, m):
    return (x + m - 1) // m * m


def _binary_pointer_kernel(x_ref, gamma_ref, beta_ref, w_ref, b_ref,
                           logits_ref, probs_ref):
    """Fused LayerNorm + Linear + sigmoid for one row-tile.

    x_ref:      (TM, H)   hidden states tile (native dtype; upcast to f32 here)
    gamma_ref:  (1, H)    f32 LayerNorm weight (resident block)
    beta_ref:   (1, H)    f32 LayerNorm bias   (resident block)
    w_ref:      (H, 2L)   f32 Linear weight, pre-transposed (resident block)
    b_ref:      (1, 2L)   f32 Linear bias      (resident block)
    logits_ref: (TM, 2L)  output logits
    probs_ref:  (TM, 2L)  output sigmoid(logits)
    """
    x = x_ref[...].astype(jnp.float32)

    # LayerNorm over the hidden dim (biased variance, matching torch, eps=1e-12).
    mean = jnp.mean(x, axis=-1, keepdims=True)
    xc = x - mean
    var = jnp.mean(xc * xc, axis=-1, keepdims=True)
    xn = xc * jax.lax.rsqrt(var + LN_EPS)
    h = xn * gamma_ref[...] + beta_ref[...]

    # Linear: (TM, H) @ (H, 2L) + (1, 2L).  Skinny matmul; FLOPs are negligible
    # vs the x HBM read, so MXU utilization is irrelevant here.
    logits = jnp.dot(h, w_ref[...], preferred_element_type=jnp.float32)
    logits = logits + b_ref[...]

    logits_ref[...] = logits.astype(logits_ref.dtype)
    probs_ref[...] = jax.nn.sigmoid(logits).astype(probs_ref.dtype)


@functools.partial(jax.jit, static_argnames=("num_labels", "row_tile", "out_dtype"))
def binary_pointer_forward(hidden_states, ln_gamma, ln_beta, fc_w, fc_b,
                           *, num_labels, row_tile=None, out_dtype=jnp.float32):
    """Replicates BinaryPointer.forward given BERT hidden states.

    hidden_states: (B, S, H)  (f32 or bf16)
    ln_gamma, ln_beta: (H,)
    fc_w: (2*num_labels, H)   -- PyTorch nn.Linear weight layout
    fc_b: (2*num_labels,)
    Returns (logits, probs), each of shape (B, S, num_labels, 2).
    """
    B, S, H = hidden_states.shape
    out_dim = 2 * num_labels
    n_rows = B * S

    # x stays in its native dtype (do not pre-cast to f32 -> keeps HBM traffic low).
    x2d = hidden_states.reshape(n_rows, H)
    # Resident parameter blocks are pre-cast to f32 ONCE here, not per grid step.
    gamma2d = ln_gamma.astype(jnp.float32).reshape(1, H)
    beta2d = ln_beta.astype(jnp.float32).reshape(1, H)
    w_t = fc_w.astype(jnp.float32).T.reshape(H, out_dim)
    b2d = fc_b.astype(jnp.float32).reshape(1, out_dim)

    x_bytes = jnp.dtype(x2d.dtype).itemsize
    out_bytes = jnp.dtype(out_dtype).itemsize

    if row_tile is None:
        # Biggest row tile such that the double-buffered x stream stays ~16 MiB,
        # capped at 1024 rows (measured roofline saturates by ~512-1024 rows).
        # Also keep the grid >= ~8 steps on large inputs so a megacore chip
        # (v7x: 2 TCs) has grid work to shard across cores.
        by_vmem = (16 << 20) // max(1, 2 * H * x_bytes)
        by_grid = max(512, -(-n_rows // 8))
        row_tile = max(8, min(1024, by_vmem, by_grid, _round_up(n_rows, 8)))
        row_tile = (row_tile // 8) * 8

    # Pad rows up to a multiple of row_tile (no divisibility requirement on B*S).
    n_pad = _round_up(n_rows, row_tile)
    if n_pad != n_rows:
        x2d = jnp.pad(x2d, ((0, n_pad - n_rows), (0, 0)))

    grid = (n_pad // row_tile,)

    # Explicit VMEM budget: double-buffered x tile + double-buffered outputs +
    # resident params, with ~2x headroom; floor at 32 MiB, cap at 48 MiB so it
    # stays comfortably inside v7x's 64 MiB physical VMEM.
    vmem_budget = (2 * row_tile * H * x_bytes
                   + 2 * 2 * row_tile * out_dim * out_bytes
                   + 2 * (H * out_dim + 2 * H + out_dim) * 4)
    vmem_limit = int(min(max(2 * vmem_budget, 32 << 20), 48 << 20))

    logits2d, probs2d = pl.pallas_call(
        _binary_pointer_kernel,
        out_shape=(jax.ShapeDtypeStruct((n_pad, out_dim), out_dtype),
                   jax.ShapeDtypeStruct((n_pad, out_dim), out_dtype)),
        grid_spec=pltpu.PrefetchScalarGridSpec(
            num_scalar_prefetch=0,
            grid=grid,
            in_specs=[
                pl.BlockSpec((row_tile, H), lambda i: (i, 0)),    # x tile (streamed)
                pl.BlockSpec((1, H), lambda i: (0, 0)),           # gamma (resident)
                pl.BlockSpec((1, H), lambda i: (0, 0)),           # beta  (resident)
                pl.BlockSpec((H, out_dim), lambda i: (0, 0)),     # W^T   (resident)
                pl.BlockSpec((1, out_dim), lambda i: (0, 0)),     # bias  (resident)
            ],
            out_specs=[
                pl.BlockSpec((row_tile, out_dim), lambda i: (i, 0)),   # logits
                pl.BlockSpec((row_tile, out_dim), lambda i: (i, 0)),   # probs
            ],
        ),
        compiler_params=pltpu.CompilerParams(
            dimension_semantics=("parallel",),
            vmem_limit_bytes=vmem_limit),
    )(x2d, gamma2d, beta2d, w_t, b2d)

    # batch_size-preserving view: (B, -1, num_labels, 2), matching torch .view.
    logits = logits2d[:n_rows].reshape(B, S, num_labels, 2)
    probs = probs2d[:n_rows].reshape(B, S, num_labels, 2)
    return logits, probs


def _reference_forward(hidden_states, ln_gamma, ln_beta, fc_w, fc_b, num_labels):
    """Pure-JAX reference matching the PyTorch semantics."""
    x = hidden_states.astype(jnp.float32)
    mean = jnp.mean(x, axis=-1, keepdims=True)
    var = jnp.mean((x - mean) ** 2, axis=-1, keepdims=True)
    xn = (x - mean) / jnp.sqrt(var + LN_EPS)
    h = xn * ln_gamma + ln_beta
    fc = h @ fc_w.T + fc_b
    B = fc.shape[0]
    logits = fc.reshape(B, -1, num_labels, 2)
    return logits, jax.nn.sigmoid(logits)


if __name__ == "__main__":
    # Small, module-consistent shapes: batch=2, seq=8, hidden=32, num_labels=4.
    B, S, H = 2, 8, 32
    NUM_LABELS = 4

    key = jax.random.PRNGKey(0)
    k_x, k_g, k_b, k_w, k_fb = jax.random.split(key, 5)

    hidden_states = jax.random.normal(k_x, (B, S, H), dtype=jnp.float32)
    ln_gamma = 1.0 + 0.1 * jax.random.normal(k_g, (H,), dtype=jnp.float32)
    ln_beta = 0.1 * jax.random.normal(k_b, (H,), dtype=jnp.float32)
    fc_w = 0.05 * jax.random.normal(k_w, (2 * NUM_LABELS, H), dtype=jnp.float32)
    fc_b = 0.05 * jax.random.normal(k_fb, (2 * NUM_LABELS,), dtype=jnp.float32)

    logits, probs = binary_pointer_forward(
        hidden_states, ln_gamma, ln_beta, fc_w, fc_b, num_labels=NUM_LABELS)
    jax.block_until_ready((logits, probs))

    ref_logits, ref_probs = _reference_forward(
        hidden_states, ln_gamma, ln_beta, fc_w, fc_b, NUM_LABELS)

    assert logits.shape == (B, S, NUM_LABELS, 2)
    assert probs.shape == (B, S, NUM_LABELS, 2)
    assert jnp.allclose(logits, ref_logits, atol=1e-5, rtol=1e-5)
    assert jnp.allclose(probs, ref_probs, atol=1e-5, rtol=1e-5)

    # Ragged-rows path: B*S not a multiple of the tile -> exercised via padding.
    hs2 = jax.random.normal(k_x, (3, 5, H), dtype=jnp.float32)
    l2, p2 = binary_pointer_forward(
        hs2, ln_gamma, ln_beta, fc_w, fc_b, num_labels=NUM_LABELS)
    jax.block_until_ready((l2, p2))
    rl2, rp2 = _reference_forward(hs2, ln_gamma, ln_beta, fc_w, fc_b, NUM_LABELS)
    assert l2.shape == (3, 5, NUM_LABELS, 2)
    assert jnp.allclose(l2, rl2, atol=1e-5, rtol=1e-5)
    assert jnp.allclose(p2, rp2, atol=1e-5, rtol=1e-5)

    print("KERNEL_OK")
</pallas_src>

<mosaic_0001>
module attributes {stable_mosaic.version = 11 : i64} {
  func.func @_binary_pointer_kernel(%arg0: i32, %arg1: memref<16x32xf32, #tpu.memory_space<vmem>>, %arg2: memref<1x32xf32, #tpu.memory_space<vmem>>, %arg3: memref<1x32xf32, #tpu.memory_space<vmem>>, %arg4: memref<32x8xf32, #tpu.memory_space<vmem>>, %arg5: memref<1x8xf32, #tpu.memory_space<vmem>>, %arg6: memref<16x8xf32, #tpu.memory_space<vmem>>, %arg7: memref<16x8xf32, #tpu.memory_space<vmem>>) attributes {dimension_semantics = [#tpu.dimension_semantics<parallel>], iteration_bounds = array<i64: 1>, scalar_prefetch = 0 : i64, scratch_operands = 0 : i64, tpu.core_type = #tpu.core_type<tc>, window_params = [{transform_indices = @transform_0, window_bounds = array<i64: 16, 32>}, {pipeline_mode = #tpu.pipeline_mode<synchronous>, transform_indices = @transform_1, window_bounds = array<i64: 1, 32>}, {pipeline_mode = #tpu.pipeline_mode<synchronous>, transform_indices = @transform_2, window_bounds = array<i64: 1, 32>}, {pipeline_mode = #tpu.pipeline_mode<synchronous>, transform_indices = @transform_3, window_bounds = array<i64: 32, 8>}, {pipeline_mode = #tpu.pipeline_mode<synchronous>, transform_indices = @transform_4, window_bounds = array<i64: 1, 8>}, {transform_indices = @transform_5, window_bounds = array<i64: 16, 8>}, {transform_indices = @transform_6, window_bounds = array<i64: 16, 8>}]} {
    %c0 = arith.constant 0 : index
    %c0_0 = arith.constant 0 : index
    %0 = vector.load %arg1[%c0, %c0_0] : memref<16x32xf32, #tpu.memory_space<vmem>>, vector<16x32xf32>
    %cst = arith.constant dense<0.000000e+00> : vector<16xf32>
    %1 = vector.multi_reduction <add>, %0, %cst [1] : vector<16x32xf32> to vector<16xf32>
    %2 = vector.shape_cast %1 : vector<16xf32> to vector<16x1xf32>
    %cst_1 = arith.constant 3.200000e+01 : f32
    %3 = vector.broadcast %cst_1 : f32 to vector<16x1xf32>
    %4 = arith.divf %2, %3 : vector<16x1xf32>
    %5 = vector.broadcast %4 : vector<16x1xf32> to vector<16x32xf32>
    %6 = arith.subf %0, %5 : vector<16x32xf32>
    %7 = arith.mulf %6, %6 : vector<16x32xf32>
    %cst_2 = arith.constant dense<0.000000e+00> : vector<16xf32>
    %8 = vector.multi_reduction <add>, %7, %cst_2 [1] : vector<16x32xf32> to vector<16xf32>
    %9 = vector.shape_cast %8 : vector<16xf32> to vector<16x1xf32>
    %cst_3 = arith.constant 3.200000e+01 : f32
    %10 = vector.broadcast %cst_3 : f32 to vector<16x1xf32>
    %11 = arith.divf %9, %10 : vector<16x1xf32>
    %cst_4 = arith.constant 9.99999996E-13 : f32
    %12 = vector.broadcast %cst_4 : f32 to vector<16x1xf32>
    %13 = arith.addf %11, %12 : vector<16x1xf32>
    %14 = math.rsqrt %13 : vector<16x1xf32>
    %15 = vector.broadcast %14 : vector<16x1xf32> to vector<16x32xf32>
    %16 = arith.mulf %6, %15 : vector<16x32xf32>
    %c0_5 = arith.constant 0 : index
    %c0_6 = arith.constant 0 : index
    %17 = vector.load %arg2[%c0_5, %c0_6] : memref<1x32xf32, #tpu.memory_space<vmem>>, vector<1x32xf32>
    %18 = vector.broadcast %17 : vector<1x32xf32> to vector<16x32xf32>
    %19 = arith.mulf %16, %18 : vector<16x32xf32>
    %c0_7 = arith.constant 0 : index
    %c0_8 = arith.constant 0 : index
    %20 = vector.load %arg3[%c0_7, %c0_8] : memref<1x32xf32, #tpu.memory_space<vmem>>, vector<1x32xf32>
    %21 = vector.broadcast %20 : vector<1x32xf32> to vector<16x32xf32>
    %22 = arith.addf %19, %21 : vector<16x32xf32>
    %c0_9 = arith.constant 0 : index
    %c0_10 = arith.constant 0 : index
    %23 = vector.load %arg4[%c0_9, %c0_10] : memref<32x8xf32, #tpu.memory_space<vmem>>, vector<32x8xf32>
    %cst_11 = arith.constant dense<0.000000e+00> : vector<16x8xf32>
    %24 = tpu.matmul %22, %23, %cst_11 {dimension_numbers = #tpu.dot_dimension_numbers<[1], [0], [0], [1], [0, 0, 1, 1], [], []>} : vector<16x32xf32>, vector<32x8xf32>, vector<16x8xf32> -> vector<16x8xf32>
    %c0_12 = arith.constant 0 : index
    %c0_13 = arith.constant 0 : index
    %25 = vector.load %arg5[%c0_12, %c0_13] : memref<1x8xf32, #tpu.memory_space<vmem>>, vector<1x8xf32>
    %26 = vector.broadcast %25 : vector<1x8xf32> to vector<16x8xf32>
    %27 = arith.addf %24, %26 : vector<16x8xf32>
    %c0_14 = arith.constant 0 : index
    %c0_15 = arith.constant 0 : index
    %28 = vector.load %arg6[%c0_14, %c0_15] : memref<16x8xf32, #tpu.memory_space<vmem>>, vector<16x8xf32>
    tpu.vector_store %arg6[%c0_14, %c0_15], %27 {strides = array<i32>} : memref<16x8xf32, #tpu.memory_space<vmem>>, vector<16x8xf32>,
    %29 = arith.negf %27 : vector<16x8xf32>
    %30 = math.exp %29 : vector<16x8xf32>
    %cst_16 = arith.constant 1.000000e+00 : f32
    %31 = vector.broadcast %cst_16 : f32 to vector<16x8xf32>
    %32 = arith.addf %31, %30 : vector<16x8xf32>
    %33 = arith.divf %31, %32 : vector<16x8xf32>
    %c0_17 = arith.constant 0 : index
    %c0_18 = arith.constant 0 : index
    %34 = vector.load %arg7[%c0_17, %c0_18] : memref<16x8xf32, #tpu.memory_space<vmem>>, vector<16x8xf32>
    tpu.vector_store %arg7[%c0_17, %c0_18], %33 {strides = array<i32>} : memref<16x8xf32, #tpu.memory_space<vmem>>, vector<16x8xf32>,
    return
  }
  func.func @transform_0(%arg0: i32) -> (i32, i32) {
    %c0_i32 = arith.constant 0 : i32
    %c0_i32_0 = arith.constant 0 : i32
    return %arg0, %c0_i32 : i32, i32
  }
  func.func @transform_1(%arg0: i32) -> (i32, i32) {
    %c0_i32 = arith.constant 0 : i32
    %c0_i32_0 = arith.constant 0 : i32
    %c0_i32_1 = arith.constant 0 : i32
    return %c0_i32, %c0_i32_0 : i32, i32
  }
  func.func @transform_2(%arg0: i32) -> (i32, i32) {
    %c0_i32 = arith.constant 0 : i32
    %c0_i32_0 = arith.constant 0 : i32
    %c0_i32_1 = arith.constant 0 : i32
    return %c0_i32, %c0_i32_0 : i32, i32
  }
  func.func @transform_3(%arg0: i32) -> (i32, i32) {
    %c0_i32 = arith.constant 0 : i32
    %c0_i32_0 = arith.constant 0 : i32
    %c0_i32_1 = arith.constant 0 : i32
    return %c0_i32, %c0_i32_0 : i32, i32
  }
  func.func @transform_4(%arg0: i32) -> (i32, i32) {
    %c0_i32 = arith.constant 0 : i32
    %c0_i32_0 = arith.constant 0 : i32
    %c0_i32_1 = arith.constant 0 : i32
    return %c0_i32, %c0_i32_0 : i32, i32
  }
  func.func @transform_5(%arg0: i32) -> (i32, i32) {
    %c0_i32 = arith.constant 0 : i32
    %c0_i32_0 = arith.constant 0 : i32
    return %arg0, %c0_i32 : i32, i32
  }
  func.func @transform_6(%arg0: i32) -> (i32, i32) {
    %c0_i32 = arith.constant 0 : i32
    %c0_i32_0 = arith.constant 0 : i32
    return %arg0, %c0_i32 : i32, i32
  }
}

</mosaic_0001>

<bundles_post_ra>
// kernel: binary_pointer_forward.1
= control target key start
LH: loop header
LB: loop body
LE: loop exit
PB: predicated region body
PF: predicated region fallthrough
CT: control target
= control target key end

     0   :  { %vm24_vm0 = vcmask 261120   ;;  %vm162_vm1 = vcmask 64512   ;;  %s315_s0 = inlined_call_operand.vmem [shape: f32[16,32], index: 0, kind: input, shape index: {}]   ;;  %s316_s3 = inlined_call_operand.vmem [shape: f32[32,8], index: 3, kind: input, shape index: {}]   ;;  %s317_s1 = inlined_call_operand.vmem [shape: f32[1,32], index: 1, kind: input, shape index: {}]   ;;  %s318_s2 = inlined_call_operand.vmem [shape: f32[1,32], index: 2, kind: input, shape index: {}]   ;;  %s319_s4 = inlined_call_operand.vmem [shape: f32[1,8], index: 4, kind: input, shape index: {}]   ;;  %s320_s5 = inlined_call_operand.vmem [shape: f32[16,8], index: 5, kind: output, shape index: {0}]   ;;  %s321_s6 = inlined_call_operand.vmem [shape: f32[16,8], index: 6, kind: output, shape index: {1}]  }
   0x1   :  { %v22_v0 = vld [vmem:[%s315_s0] sm:$0xff]  ;;  %v23_v1 = vld [vmem:[%s315_s0 + $0x8] sm:$0xff]  ;;  %v72_v16 = vld [vmem:[%s316_s3 + $0x10] sm:$0xff] }
   0x2   :  { %v25_v2 = vsel %vm24_vm0, %v22_v0, 0.0  ;;  %v28_v3 = vsel %vm24_vm0, %v23_v1, 0.0  ;;  %v70_v14 = vld [vmem:[%s316_s3] sm:$0xff]  ;;  %v71_v15 = vld [vmem:[%s316_s3 + $0x8] sm:$0xff]  ;;  %v73_v18 = vld [vmem:[%s316_s3 + $0x18] sm:$0xff] }
   0x3   :  { %26 = vadd.xlane.f32.xlu0 %v25_v2  ;;  %v211_v17 = vpack.c.bf16 %v71_v15, %v70_v14  ;;  %v215_v19 = vpack.c.bf16 %v73_v18, %v72_v16  ;;  %v187_v27 = vld [vmem:[%s317_s1] ss:$0 sm:$0xff] }
   0x4   :  { %v188_v29 = vld [vmem:[%s318_s2] ss:$0 sm:$0xff] }
   0x5   :  { %212 = vmatprep.subr.bf16.mxu0 %v211_v17  ;;  %v189_v36 = vld [vmem:[%s319_s4] ss:$0 sm:$0xff] }
   0x6   :  { %214 = vmatpush3.bf16.msra.mxu0 %v211_v17 }
   0x7   :  { %29 = vadd.xlane.f32.xlu0 %v28_v3  ;;  %216 = vmatprep.subr.bf16.mxu0 %v215_v19 }
   0xa   :  { %218 = vmatpush3.bf16.msra.mxu0 %v215_v19 }
  0x90   :  { %v27_v4 = vpop.xlane.xlu0 %26 }
  0x91   :  { %v32_v5 = vmul.f32 0.03125, %v27_v4 }
  0x93   :  { %v34_v6 = vsub.f32 %v22_v0, %v32_v5 }
  0x94   :  { %v30_v7 = vpop.xlane.xlu0 %29 }
  0x95   :  { %v33_v8 = vmul.f32 0.03125, %v30_v7  ;;  %v36_v9 = vmul.f32 %v34_v6, %v34_v6 }
  0x97   :  { %v35_v10 = vsub.f32 %v23_v1, %v33_v8  ;;  %v38_v11 = vsel %vm24_vm0, %v36_v9, 0.0 }
  0x98   :  { %39 = vadd.xlane.f32.xlu1 %v38_v11 }
  0x99   :  { %v37_v12 = vmul.f32 %v35_v10, %v35_v10 }
  0x9b   :  { %v41_v13 = vsel %vm24_vm0, %v37_v12, 0.0 }
  0x9c   :  { %42 = vadd.xlane.f32.xlu1 %v41_v13 }
 0x125   :  { %v40_v20 = vpop.xlane.xlu1 %39 }
 0x126   :  { %v44_v21 = vmul.f32 0.03125, %v40_v20 }
 0x128   :  { %v46_v22 = vadd.f32 1e-12, %v44_v21 }
 0x129   :  { %v43_v23 = vpop.xlane.xlu1 %42 }
 0x12a   :  { %219 = vrsqrt.f32 %v46_v22  ;;  %v45_v24 = vmul.f32 0.03125, %v43_v23 }
 0x12c   :  { %v47_v25 = vadd.f32 1e-12, %v45_v24 }
 0x12e   :  { %221 = vrsqrt.f32 %v47_v25 }
 0x134   :  { %v220_v26 = vpop.eup %219 }
 0x135   :  { %v50_v28 = vmul.f32 %v220_v26, %v34_v6 }
 0x137   :  { %v59_v30 = vmul.f32 %v187_v27, %v50_v28 }
 0x138   :  { %v222_v31 = vpop.eup %221 }
 0x139   :  { %v51_v32 = vmul.f32 %v222_v31, %v35_v10  ;;  %v68_v33 = vadd.f32 %v188_v29, %v59_v30 }
 0x13b   :  { %v60_v34 = vmul.f32 %v187_v27, %v51_v32  ;;  %208 = vmatprep.mubr.msk.f32.mxu0 %vm24_vm0, %v68_v33 }
 0x13d   :  { %v69_v35 = vadd.f32 %v188_v29, %v60_v34 }
 0x13f   :  { %209 = vmatmul.mubr.msk.f32.vlgmr.msra.gmra.mrb[0].mxu0 %vm24_vm0, %v69_v35 }
 0x212   :  { %v210_v37 = vpop.f32.mrb[0].mxu0 }
 0x213   :  { %v159_v38 = vadd.f32 %v210_v37, %v189_v36  ;;  %v153_v39 = vpop.f32.mrb[1].mxu0 }
 0x214   :  { %v154_v40 = vadd.f32 %v189_v36, %v153_v39 }
 0x215   :  { %164 = vst.msk [vmem:[%s320_s5 + $0x8] sm:$0xff] %vm162_vm1, %v159_v38  ;;  %v193_v41 = vmul.f32 -1.442695, %v159_v38 }
 0x216   :  { %163 = vst.msk [vmem:[%s320_s5] sm:$0xff] %vm162_vm1, %v154_v40  ;;  %v192_v42 = vmul.f32 -1.442695, %v154_v40 }
 0x217   :  { %223 = vpow2.f32 %v193_v41 }
 0x218   :  { %225 = vpow2.f32 %v192_v42 }
 0x221   :  { %v224_v43 = vpop.eup %223 }
 0x222   :  { %v226_v44 = vpop.eup %225  ;;  %v172_v45 = vadd.f32 1.0, %v224_v43 }
 0x223   :  { %v171_v46 = vadd.f32 1.0, %v226_v44 }
 0x224   :  { %227 = vrcp.f32 %v172_v45 }
 0x225   :  { %229 = vrcp.f32 %v171_v46 }
 0x22e   :  { %v228_v47 = vpop.eup %227 }
 0x22f   :  { %v230_v48 = vpop.eup %229  ;;  %178 = vst.msk [vmem:[%s321_s6 + $0x8] sm:$0xff] %vm162_vm1, %v228_v47 }
 0x230   :  { %177 = vst.msk [vmem:[%s321_s6] sm:$0xff] %vm162_vm1, %v230_v48 }

</bundles_post_ra>
